<compile_context>
chip_gen: v5e
topology: v5e:2x2
jax: 0.10.0
libtpu: 0.0.40
codegen_flags: <defaults>
</compile_context>

<pallas_src>
import functools

import jax
import jax.numpy as jnp
from jax import lax
from jax.experimental import pallas as pl
from jax.experimental.pallas import tpu as pltpu


LPAD = 128   # lane padding for num_labels (classifier output width)
VPAD = 128   # lane padding for the vocab one-hot segment of the encoder input


# ----------------------------------------------------------------------------
# One fused kernel: surrogate encoders (CLS only) + exact UnimoREModel head,
# including softmax scores, CE loss and the ratio/coeff gating.
# ----------------------------------------------------------------------------
def _fused_forward_kernel(ids_ref, lbl_ref,               # scalar-prefetch (SMEM)
                          img_ref, encw_ref, encb_ref,    # fused encoder
                          headw_ref, bcat_ref,            # block-diag cat classifier
                          cat_ref, stats_ref,             # outputs
                          *, num_labels, hv, alpha):
    f32 = jnp.float32
    B, Kimg = img_ref.shape

    # --- CLS-token one-hot built from SMEM-prefetched input_ids[:, 0] -------
    subv = lax.broadcasted_iota(jnp.int32, (B, VPAD), 0)
    lanev = lax.broadcasted_iota(jnp.int32, (B, VPAD), 1)
    idv = jnp.full((B, VPAD), -1, jnp.int32)
    for b in range(B):                                  # B is small & static
        idv = jnp.where(subv == b, ids_ref[b, 0], idv)
    tok_onehot = jnp.where(lanev == idv, 1.0, 0.0).astype(jnp.bfloat16)

    # --- single block-diagonal encoder matmul -> [vision_cls | text_cls] ----
    # (split into two dots over aligned row-slices of the same weight tensor;
    #  the text rows already contain emb @ w_text, so the embedding gather is
    #  the one-hot matmul itself)
    img_bf16 = img_ref[...].astype(jnp.bfloat16)
    pre = (jnp.dot(img_bf16, encw_ref[0:Kimg, :], preferred_element_type=f32)
           + jnp.dot(tok_onehot, encw_ref[Kimg:, :], preferred_element_type=f32)
           + encb_ref[...])
    fused = jnp.tanh(pre)                               # (B, hv+ht) f32

    # --- single 256-wide block-diagonal head matmul: [dv | dt] --------------
    d = jnp.dot(fused.astype(jnp.bfloat16), headw_ref[...],
                preferred_element_type=f32)             # (B, 2*LPAD)
    dv = d[:, :LPAD]
    dt = d[:, LPAD:]
    bias = bcat_ref[...]                                # (1, LPAD), zero past L
    half_b = bias * 0.5

    # rowsum(text_cls) without a sub-vreg slice (masked lane reduce)
    lane_h = lax.broadcasted_iota(jnp.int32, fused.shape, 1)
    t_sum = jnp.sum(jnp.where(lane_h >= hv, fused, 0.0), axis=-1, keepdims=True)

    out_v = dv + half_b                     # vision_cls @ Wv.T + b/2
    out_t = dt + t_sum * half_b             # text_cls @ (Wt.T + b/2)  (quirk)
    cat = dv + dt + bias                    # surrogate cat_classifier logits

    lane = lax.broadcasted_iota(jnp.int32, (B, LPAD), 1)
    valid = lane < num_labels
    neg = jnp.float32(-1e30)

    def _softmax(z):                        # exact divide: feeds a hard >1 branch
        m = jnp.max(z, axis=-1, keepdims=True)
        e = jnp.exp(z - m)
        return e / jnp.sum(e, axis=-1, keepdims=True)

    def _log_softmax(z):
        m = jnp.max(z, axis=-1, keepdims=True)
        s = z - m
        return s - jnp.log(jnp.sum(jnp.exp(s), axis=-1, keepdims=True))

    p_v = _softmax(jnp.where(valid, out_v, neg))
    p_t = _softmax(jnp.where(valid, out_t, neg))
    lp = _log_softmax(jnp.where(valid, cat, neg))

    # --- label one-hot from SMEM-prefetched labels ---------------------------
    sub = lax.broadcasted_iota(jnp.int32, (B, LPAD), 0)
    lblv = jnp.full((B, LPAD), -1, jnp.int32)
    for b in range(B):
        lblv = jnp.where(sub == b, lbl_ref[b], lblv)
    onehot = jnp.where(lane == lblv, 1.0, 0.0)          # f32

    # --- full in-kernel reduction to scalars (lane reduce, then sublane) -----
    sv = jnp.sum(jnp.sum(p_v * onehot, -1, keepdims=True), 0, keepdims=True)
    st = jnp.sum(jnp.sum(p_t * onehot, -1, keepdims=True), 0, keepdims=True)
    nll = -jnp.sum(jnp.sum(lp * onehot, -1, keepdims=True), 0, keepdims=True)
    loss = nll * (1.0 / B)                  # CE mean (all labels in range)

    # ratio/coeff gating (same Inf hazard as the PyTorch reference if st == 0)
    ratio_v = sv / st
    ratio_t = 1.0 / ratio_v
    one = jnp.ones_like(ratio_v)
    coeff_v = jnp.where(ratio_v > 1.0,
                        1.0 - jnp.tanh(alpha * jnp.maximum(ratio_v, 0.0)), one)
    coeff_t = jnp.where(ratio_v > 1.0, one,
                        1.0 - jnp.tanh(alpha * jnp.maximum(ratio_t, 0.0)))

    cat_ref[...] = cat                      # lane-dense (B, 128) f32 write
    slane = lax.broadcasted_iota(jnp.int32, (1, LPAD), 1)
    stats_ref[...] = (jnp.where(slane == 0, loss, 0.0)
                      + jnp.where(slane == 1, coeff_v, 0.0)
                      + jnp.where(slane == 2, coeff_t, 0.0)
                      + jnp.where(slane == 3, ratio_v, 0.0)).astype(f32)


# ----------------------------------------------------------------------------
# One-time parameter preparation: slice / transpose / pad / fold / bf16-cast.
# ----------------------------------------------------------------------------
def prepare_params(params, *, num_labels, hv, ht, vocab, C, IMG, p):
    f32 = jnp.float32
    L = num_labels
    assert L <= LPAD and vocab <= VPAD
    Kimg = C * IMG * IMG

    # Vision patch-embed weight scattered to full flattened-image rows:
    # rows outside the top-left pxp patch are zero -> no strided image slice.
    wv4 = params["w_vis"].astype(f32).reshape(C, p, p, hv)
    w_vis_full = (jnp.zeros((C, IMG, IMG, hv), f32)
                  .at[:, :p, :p, :].set(wv4)
                  .reshape(Kimg, hv))

    # Text: fold the embedding gather into the linear: onehot @ (emb @ w_text).
    emb_w = params["emb"].astype(f32) @ params["w_text"].astype(f32)   # (vocab, ht)

    # Block-diagonal fused encoder weight (Kimg + VPAD, hv + ht).
    enc_w = jnp.zeros((Kimg + VPAD, hv + ht), f32)
    enc_w = enc_w.at[:Kimg, :hv].set(w_vis_full)
    enc_w = enc_w.at[Kimg:Kimg + vocab, hv:].set(emb_w)
    enc_b = jnp.concatenate([params["b_vis"].astype(f32),
                             params["b_text"].astype(f32)]).reshape(1, hv + ht)

    # Block-diagonal head weight (hv+ht, 2*LPAD): vision lanes [0,128),
    # text lanes [128,256) -> one 256-wide MXU pass on v6e/v7x.
    w_cat = params["w_cat"].astype(f32)                 # (L, hv + ht)
    head_w = jnp.zeros((hv + ht, 2 * LPAD), f32)
    head_w = head_w.at[:hv, :L].set(jnp.transpose(w_cat[:, :hv]))
    head_w = head_w.at[hv:, LPAD:LPAD + L].set(jnp.transpose(w_cat[:, hv:]))
    b_pad = jnp.zeros((1, LPAD), f32).at[0, :L].set(params["b_cat"].astype(f32))

    return dict(enc_w=enc_w.astype(jnp.bfloat16), enc_b=enc_b,
                head_w=head_w.astype(jnp.bfloat16), b_cat_pad=b_pad)


# ----------------------------------------------------------------------------
# Full forward (surrogate backbone + exact UnimoREModel head math).
# ----------------------------------------------------------------------------
def unimo_re_forward(prep, input_ids, attention_mask, token_type_ids,
                     labels, images, *, num_labels, hv, alpha=0.5):
    del attention_mask, token_type_ids                  # surrogate ignores them
    B = input_ids.shape[0]
    C, IMG = images.shape[1], images.shape[2]
    Kimg = C * IMG * images.shape[3]
    img_flat = images.reshape(B, Kimg)                  # contiguous: no data movement

    enc_w, enc_b = prep["enc_w"], prep["enc_b"]
    head_w, b_cat = prep["head_w"], prep["b_cat_pad"]
    Kenc, Hsum = enc_w.shape

    full2 = lambda i, ids, lbl: (0, 0)                  # prefetch refs are positional
    kernel = functools.partial(_fused_forward_kernel,
                               num_labels=num_labels, hv=hv, alpha=alpha)

    cat_pad, stats = pl.pallas_call(
        kernel,
        out_shape=(jax.ShapeDtypeStruct((B, LPAD), jnp.float32),
                   jax.ShapeDtypeStruct((1, LPAD), jnp.float32)),
        grid_spec=pltpu.PrefetchScalarGridSpec(
            num_scalar_prefetch=2,                      # input_ids, labels -> SMEM
            grid=(1,),
            in_specs=[
                pl.BlockSpec((B, Kimg), full2),         # flattened images (f32)
                pl.BlockSpec((Kenc, Hsum), full2),      # block-diag encoder W (bf16)
                pl.BlockSpec((1, Hsum), full2),         # encoder bias (f32)
                pl.BlockSpec((Hsum, 2 * LPAD), full2),  # block-diag head W (bf16)
                pl.BlockSpec((1, LPAD), full2),         # lane-padded head bias (f32)
            ],
            out_specs=(pl.BlockSpec((B, LPAD), full2),
                       pl.BlockSpec((1, LPAD), full2)),
        ),
        compiler_params=pltpu.CompilerParams(
            dimension_semantics=("arbitrary",)),
    )(input_ids.astype(jnp.int32), labels.reshape(-1).astype(jnp.int32),
      img_flat, enc_w, enc_b, head_w, b_cat)

    text_logits = cat_pad[:, :num_labels]
    loss = stats[0, 0]
    coeff_v = stats[0, 1]
    coeff_t = stats[0, 2]
    return loss, text_logits, coeff_v, coeff_t


# ----------------------------------------------------------------------------
if __name__ == "__main__":
    key = jax.random.PRNGKey(0)
    B, S = 2, 8               # batch, text sequence length
    Ht, Hv = 32, 32           # text / vision hidden sizes
    L = 21                    # num_labels (20 relations + 'none')
    vocab = 64
    C, IMG, p = 3, 16, 8      # NCHW images, 8x8 surrogate patch

    ks = jax.random.split(key, 12)
    params = {
        "emb":    jax.random.normal(ks[0], (vocab, Ht), jnp.float32) * 0.02,
        "w_text": jax.random.normal(ks[1], (Ht, Ht), jnp.float32) * 0.10,
        "b_text": jax.random.normal(ks[2], (Ht,), jnp.float32) * 0.01,
        "w_vis":  jax.random.normal(ks[3], (C * p * p, Hv), jnp.float32) * 0.05,
        "b_vis":  jax.random.normal(ks[4], (Hv,), jnp.float32) * 0.01,
        # cat_classifier.dense: Linear(Hv + Ht, L) -> weight (L, Hv+Ht), bias (L,)
        "w_cat":  jax.random.normal(ks[5], (L, Hv + Ht), jnp.float32) * 0.10,
        "b_cat":  jax.random.normal(ks[6], (L,), jnp.float32) * 0.01,
    }

    input_ids = jax.random.randint(ks[7], (B, S), 0, vocab)
    attention_mask = jnp.ones((B, S), jnp.int32)
    token_type_ids = jnp.zeros((B, S), jnp.int32)
    labels = jax.random.randint(ks[8], (B,), 0, L)
    images = jax.random.normal(ks[9], (B, C, IMG, IMG), jnp.float32)  # NCHW

    prep = prepare_params(params, num_labels=L, hv=Hv, ht=Ht,
                          vocab=vocab, C=C, IMG=IMG, p=p)

    fwd = jax.jit(functools.partial(unimo_re_forward,
                                    num_labels=L, hv=Hv, alpha=0.5))
    loss, text_logits, coeff_v, coeff_t = fwd(
        prep, input_ids, attention_mask, token_type_ids, labels, images)
    jax.block_until_ready((loss, text_logits, coeff_v, coeff_t))
    assert text_logits.shape == (B, L)
    print("KERNEL_OK")
</pallas_src>

<mosaic_0001>
module attributes {stable_mosaic.version = 11 : i64} {
  func.func @_fused_forward_kernel(%arg0: i32, %arg1: memref<2x8xi32, #tpu.memory_space<smem>>, %arg2: memref<2xi32, #tpu.memory_space<smem>>, %arg3: memref<2x768xf32, #tpu.memory_space<vmem>>, %arg4: memref<896x64xbf16, #tpu.memory_space<vmem>>, %arg5: memref<1x64xf32, #tpu.memory_space<vmem>>, %arg6: memref<64x256xbf16, #tpu.memory_space<vmem>>, %arg7: memref<1x128xf32, #tpu.memory_space<vmem>>, %arg8: memref<2x128xf32, #tpu.memory_space<vmem>>, %arg9: memref<1x128xf32, #tpu.memory_space<vmem>>) attributes {dimension_semantics = [#tpu.dimension_semantics<arbitrary>], iteration_bounds = array<i64: 1>, scalar_prefetch = 2 : i64, scratch_operands = 0 : i64, tpu.core_type = #tpu.core_type<tc>, window_params = [{pipeline_mode = #tpu.pipeline_mode<synchronous>, transform_indices = @transform_0, window_bounds = array<i64: 2, 768>}, {pipeline_mode = #tpu.pipeline_mode<synchronous>, transform_indices = @transform_1, window_bounds = array<i64: 896, 64>}, {pipeline_mode = #tpu.pipeline_mode<synchronous>, transform_indices = @transform_2, window_bounds = array<i64: 1, 64>}, {pipeline_mode = #tpu.pipeline_mode<synchronous>, transform_indices = @transform_3, window_bounds = array<i64: 64, 256>}, {pipeline_mode = #tpu.pipeline_mode<synchronous>, transform_indices = @transform_4, window_bounds = array<i64: 1, 128>}, {pipeline_mode = #tpu.pipeline_mode<synchronous>, transform_indices = @transform_5, window_bounds = array<i64: 2, 128>}, {pipeline_mode = #tpu.pipeline_mode<synchronous>, transform_indices = @transform_6, window_bounds = array<i64: 1, 128>}]} {
    %0 = tpu.iota {dimensions = array<i32: 0>} : vector<2x128xi32>
    %1 = tpu.iota {dimensions = array<i32: 1>} : vector<2x128xi32>
    %c-1_i32 = arith.constant -1 : i32
    %2 = vector.broadcast %c-1_i32 : i32 to vector<2x128xi32>
    %c0_i32 = arith.constant 0 : i32
    %3 = vector.broadcast %c0_i32 : i32 to vector<2x128xi32>
    %4 = arith.cmpi eq, %0, %3 : vector<2x128xi32>
    %c0 = arith.constant 0 : index
    %c0_0 = arith.constant 0 : index
    %5 = memref.load %arg1[%c0, %c0_0] : memref<2x8xi32, #tpu.memory_space<smem>>
    %6 = vector.broadcast %5 : i32 to vector<2x128xi32>
    %7 = arith.select %4, %6, %2 : vector<2x128xi1>, vector<2x128xi32>
    %c1_i32 = arith.constant 1 : i32
    %8 = vector.broadcast %c1_i32 : i32 to vector<2x128xi32>
    %9 = arith.cmpi eq, %0, %8 : vector<2x128xi32>
    %c1 = arith.constant 1 : index
    %c0_1 = arith.constant 0 : index
    %10 = memref.load %arg1[%c1, %c0_1] : memref<2x8xi32, #tpu.memory_space<smem>>
    %11 = vector.broadcast %10 : i32 to vector<2x128xi32>
    %12 = arith.select %9, %11, %7 : vector<2x128xi1>, vector<2x128xi32>
    %13 = arith.cmpi eq, %1, %12 : vector<2x128xi32>
    %cst = arith.constant 1.000000e+00 : f32
    %cst_2 = arith.constant 0.000000e+00 : f32
    %14 = vector.broadcast %cst : f32 to vector<2x128xf32>
    %15 = vector.broadcast %cst_2 : f32 to vector<2x128xf32>
    %16 = arith.select %13, %14, %15 : vector<2x128xi1>, vector<2x128xf32>
    %17 = arith.truncf %16 : vector<2x128xf32> to vector<2x128xbf16>
    %c0_3 = arith.constant 0 : index
    %c0_4 = arith.constant 0 : index
    %18 = vector.load %arg3[%c0_3, %c0_4] : memref<2x768xf32, #tpu.memory_space<vmem>>, vector<2x768xf32>
    %19 = arith.truncf %18 : vector<2x768xf32> to vector<2x768xbf16>
    %c0_5 = arith.constant 0 : index
    %c0_6 = arith.constant 0 : index
    %20 = vector.load %arg4[%c0_5, %c0_6] : memref<896x64xbf16, #tpu.memory_space<vmem>>, vector<768x64xbf16>
    %cst_7 = arith.constant dense<0.000000e+00> : vector<2x64xf32>
    %21 = tpu.matmul %19, %20, %cst_7 {dimension_numbers = #tpu.dot_dimension_numbers<[1], [0], [0], [1], [0, 0, 1, 1], [], []>} : vector<2x768xbf16>, vector<768x64xbf16>, vector<2x64xf32> -> vector<2x64xf32>
    %c768 = arith.constant 768 : index
    %c0_8 = arith.constant 0 : index
    %22 = vector.load %arg4[%c768, %c0_8] : memref<896x64xbf16, #tpu.memory_space<vmem>>, vector<128x64xbf16>
    %cst_9 = arith.constant dense<0.000000e+00> : vector<2x64xf32>
    %23 = tpu.matmul %17, %22, %cst_9 {dimension_numbers = #tpu.dot_dimension_numbers<[1], [0], [0], [1], [0, 0, 1, 1], [], []>} : vector<2x128xbf16>, vector<128x64xbf16>, vector<2x64xf32> -> vector<2x64xf32>
    %24 = arith.addf %21, %23 : vector<2x64xf32>
    %c0_10 = arith.constant 0 : index
    %c0_11 = arith.constant 0 : index
    %25 = vector.load %arg5[%c0_10, %c0_11] : memref<1x64xf32, #tpu.memory_space<vmem>>, vector<1x64xf32>
    %26 = vector.broadcast %25 : vector<1x64xf32> to vector<2x64xf32>
    %27 = arith.addf %24, %26 : vector<2x64xf32>
    %28 = math.tanh %27 : vector<2x64xf32>
    %29 = arith.truncf %28 : vector<2x64xf32> to vector<2x64xbf16>
    %c0_12 = arith.constant 0 : index
    %c0_13 = arith.constant 0 : index
    %30 = vector.load %arg6[%c0_12, %c0_13] : memref<64x256xbf16, #tpu.memory_space<vmem>>, vector<64x256xbf16>
    %cst_14 = arith.constant dense<0.000000e+00> : vector<2x256xf32>
    %31 = tpu.matmul %29, %30, %cst_14 {dimension_numbers = #tpu.dot_dimension_numbers<[1], [0], [0], [1], [0, 0, 1, 1], [], []>} : vector<2x64xbf16>, vector<64x256xbf16>, vector<2x256xf32> -> vector<2x256xf32>
    %32 = vector.extract_strided_slice %31 {offsets = [0, 0], sizes = [2, 128], strides = [1, 1]} : vector<2x256xf32> to vector<2x128xf32>
    %33 = vector.extract_strided_slice %31 {offsets = [0, 128], sizes = [2, 128], strides = [1, 1]} : vector<2x256xf32> to vector<2x128xf32>
    %c0_15 = arith.constant 0 : index
    %c0_16 = arith.constant 0 : index
    %34 = vector.load %arg7[%c0_15, %c0_16] : memref<1x128xf32, #tpu.memory_space<vmem>>, vector<1x128xf32>
    %cst_17 = arith.constant 5.000000e-01 : f32
    %35 = vector.broadcast %cst_17 : f32 to vector<1x128xf32>
    %36 = arith.mulf %34, %35 : vector<1x128xf32>
    %37 = tpu.iota {dimensions = array<i32: 1>} : vector<2x64xi32>
    %c32_i32 = arith.constant 32 : i32
    %38 = vector.broadcast %c32_i32 : i32 to vector<2x64xi32>
    %39 = arith.cmpi sge, %37, %38 : vector<2x64xi32>
    %cst_18 = arith.constant 0.000000e+00 : f32
    %40 = vector.broadcast %cst_18 : f32 to vector<2x64xf32>
    %41 = arith.select %39, %28, %40 : vector<2x64xi1>, vector<2x64xf32>
    %cst_19 = arith.constant dense<0.000000e+00> : vector<2xf32>
    %42 = vector.multi_reduction <add>, %41, %cst_19 [1] : vector<2x64xf32> to vector<2xf32>
    %43 = vector.shape_cast %42 : vector<2xf32> to vector<2x1xf32>
    %44 = vector.broadcast %36 : vector<1x128xf32> to vector<2x128xf32>
    %45 = arith.addf %32, %44 : vector<2x128xf32>
    %46 = vector.broadcast %43 : vector<2x1xf32> to vector<2x128xf32>
    %47 = vector.broadcast %36 : vector<1x128xf32> to vector<2x128xf32>
    %48 = arith.mulf %46, %47 : vector<2x128xf32>
    %49 = arith.addf %33, %48 : vector<2x128xf32>
    %50 = arith.addf %32, %33 : vector<2x128xf32>
    %51 = vector.broadcast %34 : vector<1x128xf32> to vector<2x128xf32>
    %52 = arith.addf %50, %51 : vector<2x128xf32>
    %53 = tpu.iota {dimensions = array<i32: 1>} : vector<2x128xi32>
    %c21_i32 = arith.constant 21 : i32
    %54 = vector.broadcast %c21_i32 : i32 to vector<2x128xi32>
    %55 = arith.cmpi slt, %53, %54 : vector<2x128xi32>
    %cst_20 = arith.constant -1.000000e+30 : f32
    %56 = vector.broadcast %cst_20 : f32 to vector<2x128xf32>
    %57 = arith.select %55, %45, %56 : vector<2x128xi1>, vector<2x128xf32>
    %cst_21 = arith.constant dense<0xFF800000> : vector<2xf32>
    %58 = vector.multi_reduction <maximumf>, %57, %cst_21 [1] : vector<2x128xf32> to vector<2xf32>
    %59 = vector.shape_cast %58 : vector<2xf32> to vector<2x1xf32>
    %60 = vector.broadcast %59 : vector<2x1xf32> to vector<2x128xf32>
    %61 = arith.subf %57, %60 : vector<2x128xf32>
    %62 = math.exp %61 : vector<2x128xf32>
    %cst_22 = arith.constant dense<0.000000e+00> : vector<2xf32>
    %63 = vector.multi_reduction <add>, %62, %cst_22 [1] : vector<2x128xf32> to vector<2xf32>
    %64 = vector.shape_cast %63 : vector<2xf32> to vector<2x1xf32>
    %65 = vector.broadcast %64 : vector<2x1xf32> to vector<2x128xf32>
    %66 = arith.divf %62, %65 : vector<2x128xf32>
    %cst_23 = arith.constant -1.000000e+30 : f32
    %67 = vector.broadcast %cst_23 : f32 to vector<2x128xf32>
    %68 = arith.select %55, %49, %67 : vector<2x128xi1>, vector<2x128xf32>
    %cst_24 = arith.constant dense<0xFF800000> : vector<2xf32>
    %69 = vector.multi_reduction <maximumf>, %68, %cst_24 [1] : vector<2x128xf32> to vector<2xf32>
    %70 = vector.shape_cast %69 : vector<2xf32> to vector<2x1xf32>
    %71 = vector.broadcast %70 : vector<2x1xf32> to vector<2x128xf32>
    %72 = arith.subf %68, %71 : vector<2x128xf32>
    %73 = math.exp %72 : vector<2x128xf32>
    %cst_25 = arith.constant dense<0.000000e+00> : vector<2xf32>
    %74 = vector.multi_reduction <add>, %73, %cst_25 [1] : vector<2x128xf32> to vector<2xf32>
    %75 = vector.shape_cast %74 : vector<2xf32> to vector<2x1xf32>
    %76 = vector.broadcast %75 : vector<2x1xf32> to vector<2x128xf32>
    %77 = arith.divf %73, %76 : vector<2x128xf32>
    %cst_26 = arith.constant -1.000000e+30 : f32
    %78 = vector.broadcast %cst_26 : f32 to vector<2x128xf32>
    %79 = arith.select %55, %52, %78 : vector<2x128xi1>, vector<2x128xf32>
    %cst_27 = arith.constant dense<0xFF800000> : vector<2xf32>
    %80 = vector.multi_reduction <maximumf>, %79, %cst_27 [1] : vector<2x128xf32> to vector<2xf32>
    %81 = vector.shape_cast %80 : vector<2xf32> to vector<2x1xf32>
    %82 = vector.broadcast %81 : vector<2x1xf32> to vector<2x128xf32>
    %83 = arith.subf %79, %82 : vector<2x128xf32>
    %84 = math.exp %83 : vector<2x128xf32>
    %cst_28 = arith.constant dense<0.000000e+00> : vector<2xf32>
    %85 = vector.multi_reduction <add>, %84, %cst_28 [1] : vector<2x128xf32> to vector<2xf32>
    %86 = vector.shape_cast %85 : vector<2xf32> to vector<2x1xf32>
    %87 = math.log %86 : vector<2x1xf32>
    %88 = vector.broadcast %87 : vector<2x1xf32> to vector<2x128xf32>
    %89 = arith.subf %83, %88 : vector<2x128xf32>
    %90 = tpu.iota {dimensions = array<i32: 0>} : vector<2x128xi32>
    %c-1_i32_29 = arith.constant -1 : i32
    %91 = vector.broadcast %c-1_i32_29 : i32 to vector<2x128xi32>
    %c0_i32_30 = arith.constant 0 : i32
    %92 = vector.broadcast %c0_i32_30 : i32 to vector<2x128xi32>
    %93 = arith.cmpi eq, %90, %92 : vector<2x128xi32>
    %c0_31 = arith.constant 0 : index
    %94 = memref.load %arg2[%c0_31] : memref<2xi32, #tpu.memory_space<smem>>
    %95 = vector.broadcast %94 : i32 to vector<2x128xi32>
    %96 = arith.select %93, %95, %91 : vector<2x128xi1>, vector<2x128xi32>
    %c1_i32_32 = arith.constant 1 : i32
    %97 = vector.broadcast %c1_i32_32 : i32 to vector<2x128xi32>
    %98 = arith.cmpi eq, %90, %97 : vector<2x128xi32>
    %c1_33 = arith.constant 1 : index
    %99 = memref.load %arg2[%c1_33] : memref<2xi32, #tpu.memory_space<smem>>
    %100 = vector.broadcast %99 : i32 to vector<2x128xi32>
    %101 = arith.select %98, %100, %96 : vector<2x128xi1>, vector<2x128xi32>
    %102 = arith.cmpi eq, %53, %101 : vector<2x128xi32>
    %cst_34 = arith.constant 1.000000e+00 : f32
    %cst_35 = arith.constant 0.000000e+00 : f32
    %103 = vector.broadcast %cst_34 : f32 to vector<2x128xf32>
    %104 = vector.broadcast %cst_35 : f32 to vector<2x128xf32>
    %105 = arith.select %102, %103, %104 : vector<2x128xi1>, vector<2x128xf32>
    %106 = arith.mulf %66, %105 : vector<2x128xf32>
    %cst_36 = arith.constant dense<0.000000e+00> : vector<2xf32>
    %107 = vector.multi_reduction <add>, %106, %cst_36 [1] : vector<2x128xf32> to vector<2xf32>
    %108 = vector.shape_cast %107 : vector<2xf32> to vector<2x1xf32>
    %cst_37 = arith.constant dense<0.000000e+00> : vector<1xf32>
    %109 = vector.multi_reduction <add>, %108, %cst_37 [0] : vector<2x1xf32> to vector<1xf32>
    %110 = vector.shape_cast %109 : vector<1xf32> to vector<1x1xf32>
    %111 = arith.mulf %77, %105 : vector<2x128xf32>
    %cst_38 = arith.constant dense<0.000000e+00> : vector<2xf32>
    %112 = vector.multi_reduction <add>, %111, %cst_38 [1] : vector<2x128xf32> to vector<2xf32>
    %113 = vector.shape_cast %112 : vector<2xf32> to vector<2x1xf32>
    %cst_39 = arith.constant dense<0.000000e+00> : vector<1xf32>
    %114 = vector.multi_reduction <add>, %113, %cst_39 [0] : vector<2x1xf32> to vector<1xf32>
    %115 = vector.shape_cast %114 : vector<1xf32> to vector<1x1xf32>
    %116 = arith.mulf %89, %105 : vector<2x128xf32>
    %cst_40 = arith.constant dense<0.000000e+00> : vector<2xf32>
    %117 = vector.multi_reduction <add>, %116, %cst_40 [1] : vector<2x128xf32> to vector<2xf32>
    %118 = vector.shape_cast %117 : vector<2xf32> to vector<2x1xf32>
    %cst_41 = arith.constant dense<0.000000e+00> : vector<1xf32>
    %119 = vector.multi_reduction <add>, %118, %cst_41 [0] : vector<2x1xf32> to vector<1xf32>
    %120 = vector.shape_cast %119 : vector<1xf32> to vector<1x1xf32>
    %cst_42 = arith.constant 0.000000e+00 : f32
    %121 = vector.broadcast %cst_42 : f32 to vector<1x1xf32>
    %122 = arith.subf %121, %120 : vector<1x1xf32>
    %cst_43 = arith.constant 5.000000e-01 : f32
    %123 = vector.broadcast %cst_43 : f32 to vector<1x1xf32>
    %124 = arith.mulf %122, %123 : vector<1x1xf32>
    %125 = arith.divf %110, %115 : vector<1x1xf32>
    %cst_44 = arith.constant 1.000000e+00 : f32
    %126 = vector.broadcast %cst_44 : f32 to vector<1x1xf32>
    %127 = arith.divf %126, %125 : vector<1x1xf32>
    %cst_45 = arith.constant 1.000000e+00 : f32
    %128 = vector.broadcast %cst_45 : f32 to vector<1x1xf32>
    %cst_46 = arith.constant 1.000000e+00 : f32
    %129 = vector.broadcast %cst_46 : f32 to vector<1x1xf32>
    %130 = arith.cmpf ogt, %125, %129 : vector<1x1xf32>
    %cst_47 = arith.constant 0.000000e+00 : f32
    %131 = vector.broadcast %cst_47 : f32 to vector<1x1xf32>
    %132 = arith.maximumf %125, %131 : vector<1x1xf32>
    %cst_48 = arith.constant 5.000000e-01 : f32
    %133 = vector.broadcast %cst_48 : f32 to vector<1x1xf32>
    %134 = arith.mulf %133, %132 : vector<1x1xf32>
    %135 = math.tanh %134 : vector<1x1xf32>
    %cst_49 = arith.constant 1.000000e+00 : f32
    %136 = vector.broadcast %cst_49 : f32 to vector<1x1xf32>
    %137 = arith.subf %136, %135 : vector<1x1xf32>
    %138 = arith.select %130, %137, %128 : vector<1x1xi1>, vector<1x1xf32>
    %cst_50 = arith.constant 1.000000e+00 : f32
    %139 = vector.broadcast %cst_50 : f32 to vector<1x1xf32>
    %140 = arith.cmpf ogt, %125, %139 : vector<1x1xf32>
    %cst_51 = arith.constant 0.000000e+00 : f32
    %141 = vector.broadcast %cst_51 : f32 to vector<1x1xf32>
    %142 = arith.maximumf %127, %141 : vector<1x1xf32>
    %cst_52 = arith.constant 5.000000e-01 : f32
    %143 = vector.broadcast %cst_52 : f32 to vector<1x1xf32>
    %144 = arith.mulf %143, %142 : vector<1x1xf32>
    %145 = math.tanh %144 : vector<1x1xf32>
    %cst_53 = arith.constant 1.000000e+00 : f32
    %146 = vector.broadcast %cst_53 : f32 to vector<1x1xf32>
    %147 = arith.subf %146, %145 : vector<1x1xf32>
    %148 = arith.select %140, %128, %147 : vector<1x1xi1>, vector<1x1xf32>
    %c0_54 = arith.constant 0 : index
    %c0_55 = arith.constant 0 : index
    %149 = vector.load %arg8[%c0_54, %c0_55] : memref<2x128xf32, #tpu.memory_space<vmem>>, vector<2x128xf32>
    tpu.vector_store %arg8[%c0_54, %c0_55], %52 {strides = array<i32>} : memref<2x128xf32, #tpu.memory_space<vmem>>, vector<2x128xf32>,
    %150 = tpu.iota {dimensions = array<i32: 1>} : vector<1x128xi32>
    %c0_i32_56 = arith.constant 0 : i32
    %151 = vector.broadcast %c0_i32_56 : i32 to vector<1x128xi32>
    %152 = arith.cmpi eq, %150, %151 : vector<1x128xi32>
    %cst_57 = arith.constant 0.000000e+00 : f32
    %153 = vector.shape_cast %124 : vector<1x1xf32> to vector<1x1xf32>
    %154 = vector.broadcast %153 : vector<1x1xf32> to vector<1x128xf32>
    %155 = vector.broadcast %cst_57 : f32 to vector<1x128xf32>
    %156 = arith.select %152, %154, %155 : vector<1x128xi1>, vector<1x128xf32>
    %c1_i32_58 = arith.constant 1 : i32
    %157 = vector.broadcast %c1_i32_58 : i32 to vector<1x128xi32>
    %158 = arith.cmpi eq, %150, %157 : vector<1x128xi32>
    %cst_59 = arith.constant 0.000000e+00 : f32
    %159 = vector.shape_cast %138 : vector<1x1xf32> to vector<1x1xf32>
    %160 = vector.broadcast %159 : vector<1x1xf32> to vector<1x128xf32>
    %161 = vector.broadcast %cst_59 : f32 to vector<1x128xf32>
    %162 = arith.select %158, %160, %161 : vector<1x128xi1>, vector<1x128xf32>
    %163 = arith.addf %156, %162 : vector<1x128xf32>
    %c2_i32 = arith.constant 2 : i32
    %164 = vector.broadcast %c2_i32 : i32 to vector<1x128xi32>
    %165 = arith.cmpi eq, %150, %164 : vector<1x128xi32>
    %cst_60 = arith.constant 0.000000e+00 : f32
    %166 = vector.shape_cast %148 : vector<1x1xf32> to vector<1x1xf32>
    %167 = vector.broadcast %166 : vector<1x1xf32> to vector<1x128xf32>
    %168 = vector.broadcast %cst_60 : f32 to vector<1x128xf32>
    %169 = arith.select %165, %167, %168 : vector<1x128xi1>, vector<1x128xf32>
    %170 = arith.addf %163, %169 : vector<1x128xf32>
    %c3_i32 = arith.constant 3 : i32
    %171 = vector.broadcast %c3_i32 : i32 to vector<1x128xi32>
    %172 = arith.cmpi eq, %150, %171 : vector<1x128xi32>
    %cst_61 = arith.constant 0.000000e+00 : f32
    %173 = vector.shape_cast %125 : vector<1x1xf32> to vector<1x1xf32>
    %174 = vector.broadcast %173 : vector<1x1xf32> to vector<1x128xf32>
    %175 = vector.broadcast %cst_61 : f32 to vector<1x128xf32>
    %176 = arith.select %172, %174, %175 : vector<1x128xi1>, vector<1x128xf32>
    %177 = arith.addf %170, %176 : vector<1x128xf32>
    %c0_62 = arith.constant 0 : index
    %c0_63 = arith.constant 0 : index
    %178 = vector.load %arg9[%c0_62, %c0_63] : memref<1x128xf32, #tpu.memory_space<vmem>>, vector<1x128xf32>
    tpu.vector_store %arg9[%c0_62, %c0_63], %177 {strides = array<i32>} : memref<1x128xf32, #tpu.memory_space<vmem>>, vector<1x128xf32>,
    return
  }
  func.func @transform_0(%arg0: i32, %arg1: memref<2x8xi32, #tpu.memory_space<smem>>, %arg2: memref<2xi32, #tpu.memory_space<smem>>) -> (i32, i32) {
    %c0_i32 = arith.constant 0 : i32
    %c0_i32_0 = arith.constant 0 : i32
    %c0_i32_1 = arith.constant 0 : i32
    return %c0_i32, %c0_i32_0 : i32, i32
  }
  func.func @transform_1(%arg0: i32, %arg1: memref<2x8xi32, #tpu.memory_space<smem>>, %arg2: memref<2xi32, #tpu.memory_space<smem>>) -> (i32, i32) {
    %c0_i32 = arith.constant 0 : i32
    %c0_i32_0 = arith.constant 0 : i32
    %c0_i32_1 = arith.constant 0 : i32
    return %c0_i32, %c0_i32_0 : i32, i32
  }
  func.func @transform_2(%arg0: i32, %arg1: memref<2x8xi32, #tpu.memory_space<smem>>, %arg2: memref<2xi32, #tpu.memory_space<smem>>) -> (i32, i32) {
    %c0_i32 = arith.constant 0 : i32
    %c0_i32_0 = arith.constant 0 : i32
    %c0_i32_1 = arith.constant 0 : i32
    return %c0_i32, %c0_i32_0 : i32, i32
  }
  func.func @transform_3(%arg0: i32, %arg1: memref<2x8xi32, #tpu.memory_space<smem>>, %arg2: memref<2xi32, #tpu.memory_space<smem>>) -> (i32, i32) {
    %c0_i32 = arith.constant 0 : i32
    %c0_i32_0 = arith.constant 0 : i32
    %c0_i32_1 = arith.constant 0 : i32
    return %c0_i32, %c0_i32_0 : i32, i32
  }
  func.func @transform_4(%arg0: i32, %arg1: memref<2x8xi32, #tpu.memory_space<smem>>, %arg2: memref<2xi32, #tpu.memory_space<smem>>) -> (i32, i32) {
    %c0_i32 = arith.constant 0 : i32
    %c0_i32_0 = arith.constant 0 : i32
    %c0_i32_1 = arith.constant 0 : i32
    return %c0_i32, %c0_i32_0 : i32, i32
  }
  func.func @transform_5(%arg0: i32, %arg1: memref<2x8xi32, #tpu.memory_space<smem>>, %arg2: memref<2xi32, #tpu.memory_space<smem>>) -> (i32, i32) {
    %c0_i32 = arith.constant 0 : i32
    %c0_i32_0 = arith.constant 0 : i32
    %c0_i32_1 = arith.constant 0 : i32
    return %c0_i32, %c0_i32_0 : i32, i32
  }
  func.func @transform_6(%arg0: i32, %arg1: memref<2x8xi32, #tpu.memory_space<smem>>, %arg2: memref<2xi32, #tpu.memory_space<smem>>) -> (i32, i32) {
    %c0_i32 = arith.constant 0 : i32
    %c0_i32_0 = arith.constant 0 : i32
    %c0_i32_1 = arith.constant 0 : i32
    return %c0_i32, %c0_i32_0 : i32, i32
  }
}

</mosaic_0001>

<bundles_post_ra>
// kernel: unimo_re_forward.1
= control target key start
LH: loop header
LB: loop body
LE: loop exit
PB: predicated region body
PF: predicated region fallthrough
CT: control target
= control target key end

     0   :  { %s1311_s11 = smov [#allocation3]   ;;  %s1312_s12 = smov [#allocation4]   ;;  %s1647_s0 = inlined_call_operand.vmem [shape: s32[2,8], index: 0, kind: input, shape index: {}]   ;;  %s1648_s2 = inlined_call_operand.vmem [shape: f32[2,768], index: 2, kind: input, shape index: {}]   ;;  %s1649_s3 = inlined_call_operand.vmem [shape: bf16[896,64], index: 3, kind: input, shape index: {}]   ;;  %s1650_s4 = inlined_call_operand.vmem [shape: f32[1,64], index: 4, kind: input, shape index: {}]   ;;  %s1651_s5 = inlined_call_operand.vmem [shape: bf16[64,256], index: 5, kind: input, shape index: {}]   ;;  %s1652_s6 = inlined_call_operand.vmem [shape: f32[1,128], index: 6, kind: input, shape index: {}]   ;;  %s1653_s7 = inlined_call_operand.hbm [shape: f32[2,128], index: 7, kind: output, shape index: {0}]   ;;  %s1654_s8 = inlined_call_operand.vmem [shape: f32[1,128], index: 8, kind: output, shape index: {1}]   ;;  %s1655_s1 = inlined_call_operand.vmem [shape: s32[2], index: 1, kind: input, shape index: {}]  }
   0x1   :  { %s15_s29 = sshll.u32 %s1647_s0, 4  ;;  %s20_s10 = sshll.u32 %s1655_s1, 4  ;;  %s16_s29 = int_to_ptr.vmem [resolvable:$true] %s15_s29  ;;  %s21_s10 = int_to_ptr.vmem [resolvable:$true] %s20_s10 }
   0x2   :  { %18 = dma.vmem_to_smem %s16_s29, 32, %s1311_s11, [#allocation2] }
   0x3   :  { %23 = dma.vmem_to_smem %s21_s10, 16, %s1312_s12, [#allocation2] }
   0x4   :  { %1307 = dma.done.wait [#allocation2], 48 }
   0x5   :  { %1308 = vsyncadd [#allocation2], 4294967248 }
   0x6   :  { %26 = sfence }
   0x7   :  { %v1221_v0 = vld [vmem:[%s1649_s3 + $0x1b8] sm:$0xff]  ;;  %v1220_v3 = vld [vmem:[%s1649_s3 + $0x1b0] sm:$0xff]  ;;  %v1219_v7 = vld [vmem:[%s1649_s3 + $0x1a8] sm:$0xff]  ;;  %v39_v13 = vlaneseq  ;;  %s44_s15 = sld [smem:[#allocation3]] }
   0x8   :  { %v1173_v1 = vld [vmem:[%s1649_s3 + $0x38] sm:$0xff]  ;;  %239 = vmatpush.bf16.msra.mxu0 %v1221_v0  ;;  %v1172_v4 = vld [vmem:[%s1649_s3 + $0x30] sm:$0xff]  ;;  %v1171_v8 = vld [vmem:[%s1649_s3 + $0x28] sm:$0xff]  ;;  %s1415_s20 = sld [smem:[#allocation3 + $0x80]] }
   0x9   :  { %v1181_v2 = vld [vmem:[%s1649_s3 + $0x78] sm:$0xff]  ;;  %540 = vmatpush.bf16.msra.mxu1 %v1173_v1  ;;  %v1180_v5 = vld [vmem:[%s1649_s3 + $0x70] sm:$0xff]  ;;  %v1179_v9 = vld [vmem:[%s1649_s3 + $0x68] sm:$0xff]  ;;  %v1423_v19 = vshrl.u32 %v39_v13, 7 }
   0xa   :  { %553 = vmatpush.bf16.msra.mxu2 %v1181_v2  ;;  %v1189_v6 = vld [vmem:[%s1649_s3 + $0xb8] sm:$0xff]  ;;  %v1188_v10 = vld [vmem:[%s1649_s3 + $0xb0] sm:$0xff]  ;;  %v1218_v11 = vld [vmem:[%s1649_s3 + $0x1a0] sm:$0xff] }
   0xb   :  { %566 = vmatpush.bf16.msra.mxu3 %v1189_v6  ;;  %v1170_v12 = vld [vmem:[%s1649_s3 + $0x20] sm:$0xff]  ;;  %v1187_v15 = vld [vmem:[%s1649_s3 + $0xa8] sm:$0xff]  ;;  %v1217_v17 = vld [vmem:[%s1649_s3 + $0x198] sm:$0xff] }
   0xc   :  { %240 = vmatpush.bf16.msra.mxu0 %v1220_v3  ;;  %v1178_v14 = vld [vmem:[%s1649_s3 + $0x60] sm:$0xff]  ;;  %v1169_v18 = vld [vmem:[%s1649_s3 + $0x18] sm:$0xff] }
   0xd   :  { %541 = vmatpush.bf16.msra.mxu1 %v1172_v4  ;;  %v54_v16 = vld [vmem:[%s1648_s2] sm:$0xff]  ;;  %v1177_v20 = vld [vmem:[%s1649_s3 + $0x58] sm:$0xff] }
   0xe   :  { %554 = vmatpush.bf16.msra.mxu2 %v1180_v5  ;;  %58 = vst [vmem:[#allocation1] ss:$4 sm:$0xff] %v54_v16  ;;  %v1186_v21 = vld [vmem:[%s1649_s3 + $0xa0] sm:$0xff] }
   0xf   :  { %567 = vmatpush.bf16.msra.mxu3 %v1188_v10 }
  0x10   :  { %241 = vmatpush.bf16.msra.mxu0 %v1219_v7 }
  0x11   :  { %542 = vmatpush.bf16.msra.mxu1 %v1171_v8 }
  0x12   :  { %555 = vmatpush.bf16.msra.mxu2 %v1179_v9 }
  0x13   :  { %568 = vmatpush.bf16.msra.mxu3 %v1187_v15 }
  0x14   :  { %242 = vmatpush.bf16.msra.mxu0 %v1218_v11 }
  0x15   :  { %543 = vmatpush.bf16.msra.mxu1 %v1170_v12 }
  0x16   :  { %556 = vmatpush.bf16.msra.mxu2 %v1178_v14 }
  0x17   :  { %27 = vsyncpa [#allocation6], 0  ;;  %v1216_v22 = vld [vmem:[%s1649_s3 + $0x190] sm:$0xff]  ;;  %vm43_vm0 = vcmp.eq.s32.totalorder %v1423_v19, 0  ;;  %v45_v24 = vstv %s44_s15  ;;  %569 = vmatpush.bf16.msra.mxu3 %v1186_v21  ;;  %v1185_v26 = vld [vmem:[%s1649_s3 + $0x98] sm:$0xff]  ;;  %vm47_vm1 = vcmp.eq.s32.totalorder %v1423_v19, 1  ;;  %v49_v28 = vstv %s1415_s20 }
  0x18   :  { %243 = vmatpush.bf16.msra.mxu0 %v1217_v17  ;;  %v1168_v23 = vld [vmem:[%s1649_s3 + $0x10] sm:$0xff]  ;;  %v46_v27 = vsel %vm43_vm0, %v45_v24, 4294967295  ;;  %v55_v29 = vld [vmem:[%s1648_s2 + $0x8] sm:$0xf]  ;;  %v1463_v34 = vand.u32 127, %v39_v13  ;;  %v1214_v36 = vld [vmem:[%s1649_s3 + $0x180] sm:$0xff] }
  0x19   :  { %544 = vmatpush.bf16.msra.mxu1 %v1169_v18  ;;  %v1176_v25 = vld [vmem:[%s1649_s3 + $0x50] sm:$0xff]  ;;  %v1215_v30 = vld [vmem:[%s1649_s3 + $0x188] sm:$0xff]  ;;  %60 = vst [vmem:[#allocation1 + $0x20] ss:$4 sm:$0xff] %v55_v29  ;;  %v50_v35 = vsel %vm47_vm1, %v49_v28, %v46_v27  ;;  %v1166_v37 = vld [vmem:[%s1649_s3] sm:$0xff]  ;;  %vm707_vm5 = vcmask 517120  }
  0x1a   :  { %557 = vmatpush.bf16.msra.mxu2 %v1177_v20  ;;  %v1167_v31 = vld [vmem:[%s1649_s3 + $0x8] sm:$0xff]  ;;  %v1184_v33 = vld [vmem:[%s1649_s3 + $0x90] sm:$0xff]  ;;  %v1174_v38 = vld [vmem:[%s1649_s3 + $0x40] sm:$0xff]  ;;  %vm51_vm2 = vcmp.eq.s32.totalorder %v1463_v34, %v50_v35  ;;  %v1313_v50 = vmov 1.0|1.0   ;;  %vm705_vm4 = vcmp.ge.s32.totalorder %v1463_v34, 32 }
  0x1b   :  { %v1175_v32 = vld [vmem:[%s1649_s3 + $0x48] sm:$0xff]  ;;  %570 = vmatpush.bf16.msra.mxu3 %v1185_v26  ;;  %v1197_v39 = vld [vmem:[%s1649_s3 + $0xf8] sm:$0xff]  ;;  %v61_v41 = vld.sshfl [vmem:[#allocation1] sm:$0xff pattern:$0x73625140]  ;;  %vm673_vm6 = vcmask 523264  }
  0x1c   :  { %244 = vmatpush.bf16.msra.mxu0 %v1216_v22  ;;  %v62_v40 = vld.sshfl [vmem:[#allocation1 + $0x8] sm:$0xff pattern:$0x73625140]  ;;  %v1205_v42 = vld [vmem:[%s1649_s3 + $0x138] sm:$0xff]  ;;  %vm937_vm3 = vmpackc.low %vm51_vm2, %vm51_vm2  ;;  %v73_v46 = vpack.c.bf16 %v61_v41, %v61_v41  ;;  %vm722_vm7 = vcmp.lt.s32.totalorder %v1463_v34, 21  ;;  %vm724_vm8 = vcmask 1041408  }
  0x1d   :  { %545 = vmatpush.bf16.msra.mxu1 %v1168_v23  ;;  %v1213_v43 = vld [vmem:[%s1649_s3 + $0x178] sm:$0xff]  ;;  %v1183_v44 = vld [vmem:[%s1649_s3 + $0x88] sm:$0xff]  ;;  %v74_v45 = vpack.c.bf16 %v62_v40, %v62_v40  ;;  %v1196_v47 = vld [vmem:[%s1649_s3 + $0xf0] sm:$0xff]  ;;  %s1165_s15 = sld [smem:[#allocation4 + $0x1]]  ;;  %s1315_s17 = smov [#allocation5]  }
  0x1e   :  { %558 = vmatpush.bf16.msra.mxu2 %v1176_v25  ;;  %v1204_v48 = vld [vmem:[%s1649_s3 + $0x130] sm:$0xff]  ;;  %v1182_v51 = vld [vmem:[%s1649_s3 + $0x80] sm:$0xff]  ;;  %v1195_v53 = vld [vmem:[%s1649_s3 + $0xe8] sm:$0xff]  ;;  %s889_s1 = sshll.u32 %s1315_s17, 4  ;;  %s891_s21 = sshll.u32 %s1653_s7, 4  ;;  %s890_s1 = int_to_ptr.vmem [resolvable:$true] %s889_s1  ;;  %s892_s21 = int_to_ptr.hbm [resolvable:$true] %s891_s21 }
  0x1f   :  { %571 = vmatpush.bf16.msra.mxu3 %v1184_v33  ;;  %v1212_v49 = vld [vmem:[%s1649_s3 + $0x170] sm:$0xff]  ;;  %v1203_v54 = vld [vmem:[%s1649_s3 + $0x128] sm:$0xff]  ;;  %v1194_v57 = vld [vmem:[%s1649_s3 + $0xe0] sm:$0xff] }
  0x20   :  { %245 = vmatpush.bf16.msra.mxu0 %v1215_v30  ;;  %v63_v52 = vld.sshfl [vmem:[#allocation1 + $0x10] sm:$0xff pattern:$0x73625140]  ;;  %v1211_v55 = vld [vmem:[%s1649_s3 + $0x168] sm:$0xff]  ;;  %v1202_v58 = vld [vmem:[%s1649_s3 + $0x120] sm:$0xff] }
  0x21   :  { %546 = vmatpush.bf16.msra.mxu1 %v1167_v31  ;;  %v75_v56 = vpack.c.bf16 %v63_v52, %v63_v52  ;;  %v1210_v59 = vld [vmem:[%s1649_s3 + $0x160] sm:$0xff]  ;;  %v1193_v60 = vld [vmem:[%s1649_s3 + $0xd8] sm:$0xff]  ;;  %v1192_v63 = vld [vmem:[%s1649_s3 + $0xd0] sm:$0xff] }
  0x22   :  { %559 = vmatpush.bf16.msra.mxu2 %v1175_v32  ;;  %v1201_v61 = vld [vmem:[%s1649_s3 + $0x118] sm:$0xff]  ;;  %v1200_v0 = vld [vmem:[%s1649_s3 + $0x110] sm:$0xff]  ;;  %v1191_v2 = vld [vmem:[%s1649_s3 + $0xc8] sm:$0xff] }
  0x23   :  { %572 = vmatpush.bf16.msra.mxu3 %v1183_v44  ;;  %v1209_v62 = vld [vmem:[%s1649_s3 + $0x158] sm:$0xff]  ;;  %v1208_v1 = vld [vmem:[%s1649_s3 + $0x150] sm:$0xff]  ;;  %v1199_v3 = vld [vmem:[%s1649_s3 + $0x108] sm:$0xff] }
  0x24   :  { %246 = vmatpush.bf16.msra.mxu0 %v1214_v36  ;;  %v1207_v4 = vld [vmem:[%s1649_s3 + $0x148] sm:$0xff]  ;;  %v1190_v5 = vld [vmem:[%s1649_s3 + $0xc0] sm:$0xff]  ;;  %v64_v8 = vld.sshfl [vmem:[#allocation1 + $0x18] sm:$0xff pattern:$0x73625140] }
  0x25   :  { %547 = vmatpush.bf16.msra.mxu1 %v1166_v37  ;;  %v1198_v6 = vld [vmem:[%s1649_s3 + $0x100] sm:$0xff]  ;;  %v66_v10 = vld.sshfl [vmem:[#allocation1 + $0x28] sm:$0xff pattern:$0x73625140]  ;;  %v76_v11 = vpack.c.bf16 %v64_v8, %v64_v8  ;;  %v1157_v15 = vld [vmem:[%s1651_s5 + $0x30] sm:$0xf] }
  0x26   :  { %560 = vmatpush.bf16.msra.mxu2 %v1174_v38  ;;  %v1206_v7 = vld [vmem:[%s1649_s3 + $0x140] sm:$0xff]  ;;  %v78_v13 = vpack.c.bf16 %v66_v10, %v66_v10  ;;  %v1229_v16 = vld [vmem:[%s1651_s5 + $0x34] sm:$0xf0]  ;;  %v1227_v21 = vld [vmem:[%s1651_s5 + $0x24] sm:$0xf0] }
  0x27   :  { %938 = vmatmul.msk.bf16.vlgmr.msra.gmra.mxu0 %vm937_vm3, %v1313_v50  ;;  %573 = vmatpush.bf16.msra.mxu3 %v1182_v51  ;;  %v65_v9 = vld.sshfl [vmem:[#allocation1 + $0x20] sm:$0xff pattern:$0x73625140]  ;;  %v1158_v18 = vor.u32 %v1229_v16, %v1157_v15  ;;  %v1141_v25 = vld [vmem:[%s1651_s5 + $0x10] sm:$0xf] }
  0x28   :  { %579 = vmatpush.bf16.msrb.mxu0 %v1197_v39  ;;  %548 = vmatmul.bf16.vlgmr.msra.gmra.mxu1 %v73_v46  ;;  %v77_v12 = vpack.c.bf16 %v65_v9, %v65_v9  ;;  %v1149_v20 = vld [vmem:[%s1651_s5 + $0x20] sm:$0xf]  ;;  %v1225_v26 = vld [vmem:[%s1651_s5 + $0x14] sm:$0xf0]  ;;  %v1223_v30 = vld [vmem:[%s1651_s5 + $0x4] sm:$0xf0] }
  0x29   :  { %592 = vmatpush.bf16.msrb.mxu1 %v1205_v42  ;;  %561 = vmatmul.bf16.vlgmr.msra.gmra.mxu2 %v74_v45  ;;  %v1150_v22 = vor.u32 %v1227_v21, %v1149_v20  ;;  %v1142_v28 = vor.u32 %v1225_v26, %v1141_v25  ;;  %v1133_v29 = vld [vmem:[%s1651_s5] sm:$0xf]  ;;  %v1228_v31 = vld [vmem:[%s1651_s5 + $0x34] sm:$0xf]  ;;  %v1159_v33 = vld [vmem:[%s1651_s5 + $0x38] sm:$0xf0] }
  0x2a   :  { %605 = vmatpush.bf16.msrb.mxu2 %v1213_v43  ;;  %574 = vmatmul.bf16.vlgmr.msra.gmra.mxu3 %v75_v56  ;;  %v1134_v32 = vor.u32 %v1223_v30, %v1133_v29  ;;  %v1162_v36 = vor.u32 %v1228_v31, %v1159_v33  ;;  %v1226_v38 = vld [vmem:[%s1651_s5 + $0x24] sm:$0xf]  ;;  %v1151_v39 = vld [vmem:[%s1651_s5 + $0x28] sm:$0xf0]  ;;  %v1224_v40 = vld [vmem:[%s1651_s5 + $0x14] sm:$0xf] }
  0x2b   :  { %681 = vmatpush.bf16.msrb.mxu3 %v1158_v18  ;;  %v1154_v41 = vor.u32 %v1226_v38, %v1151_v39  ;;  %v1143_v42 = vld [vmem:[%s1651_s5 + $0x18] sm:$0xf0]  ;;  %v1222_v46 = vld [vmem:[%s1651_s5 + $0x4] sm:$0xf] }
  0x2c   :  { %580 = vmatpush.bf16.msrb.mxu0 %v1196_v47  ;;  %v1146_v44 = vor.u32 %v1224_v40, %v1143_v42  ;;  %v1135_v47 = vld [vmem:[%s1651_s5 + $0x8] sm:$0xf0] }
  0x2d   :  { %593 = vmatpush.bf16.msrb.mxu1 %v1204_v48 }
  0x2e   :  { %606 = vmatpush.bf16.msrb.mxu2 %v1212_v49  ;;  %v1138_v49 = vor.u32 %v1222_v46, %v1135_v47 }
  0x2f   :  { %682 = vmatpush.bf16.msrb.mxu3 %v1150_v22 }
  0x30   :  { %581 = vmatpush.bf16.msrb.mxu0 %v1195_v53 }
  0x31   :  { %594 = vmatpush.bf16.msrb.mxu1 %v1203_v54 }
  0x32   :  { %607 = vmatpush.bf16.msrb.mxu2 %v1211_v55  ;;  %v1235_v55 = vld [vmem:[%s1650_s4] ss:$0 sm:$0xff] }
  0x33   :  { %683 = vmatpush.bf16.msrb.mxu3 %v1142_v28 }
  0x34   :  { %582 = vmatpush.bf16.msrb.mxu0 %v1194_v57 }
  0x35   :  { %595 = vmatpush.bf16.msrb.mxu1 %v1202_v58 }
  0x36   :  { %608 = vmatpush.bf16.msrb.mxu2 %v1210_v59 }
  0x37   :  { %684 = vmatpush.bf16.msrb.mxu3 %v1134_v32 }
  0x38   :  { %583 = vmatpush.bf16.msrb.mxu0 %v1193_v60 }
  0x39   :  { %596 = vmatpush.bf16.msrb.mxu1 %v1201_v61 }
  0x3a   :  { %609 = vmatpush.bf16.msrb.mxu2 %v1209_v62 }
  0x3b   :  { %694 = vmatpush.bf16.msra.mxu3 %v1162_v36 }
  0x3c   :  { %584 = vmatpush.bf16.msrb.mxu0 %v1192_v63 }
  0x3d   :  { %597 = vmatpush.bf16.msrb.mxu1 %v1200_v0 }
  0x3e   :  { %610 = vmatpush.bf16.msrb.mxu2 %v1208_v1 }
  0x3f   :  { %695 = vmatpush.bf16.msra.mxu3 %v1154_v41 }
  0x40   :  { %585 = vmatpush.bf16.msrb.mxu0 %v1191_v2  ;;  %v703_v2 = vld [vmem:[%s1652_s6] sm:$0x1] }
  0x41   :  { %598 = vmatpush.bf16.msrb.mxu1 %v1199_v3  ;;  %v704_v3 = vmul.f32 0.5, %v703_v2 }
  0x42   :  { %611 = vmatpush.bf16.msrb.mxu2 %v1207_v4 }
  0x43   :  { %696 = vmatpush.bf16.msra.mxu3 %v1146_v44  ;;  %v712_v4 = vperm.slane %v704_v3, 0  ;;  %v791_v44 = vstv %s1165_s15 }
  0x44   :  { %586 = vmatpush.bf16.msrb.mxu0 %v1190_v5 }
  0x45   :  { %599 = vmatpush.bf16.msrb.mxu1 %v1198_v6 }
  0x46   :  { %612 = vmatpush.bf16.msrb.mxu2 %v1206_v7 }
  0x47   :  { %587 = vmatmul.bf16.vlgmr.msrb.gmra.mxu0 %v76_v11  ;;  %697 = vmatpush.bf16.msra.mxu3 %v1138_v49 }
  0x48   :  { %600 = vmatmul.bf16.vlgmr.msrb.gmra.mxu1 %v77_v12  ;;  %v1236_v12 = vld [vmem:[%s1652_s6] ss:$0 sm:$0xff]  ;;  %s787_s6 = sld [smem:[#allocation4]] }
  0x49   :  { %613 = vmatmul.bf16.vlgmr.msrb.gmra.mxu2 %v78_v13 }
  0x4e   :  { %v788_v40 = vstv %s787_s6 }
  0x4f   :  { %v789_v42 = vsel %vm43_vm0, %v788_v40, 4294967295 }
  0x50   :  { %v792_v47 = vsel %vm47_vm1, %v791_v44, %v789_v42 }
  0x51   :  { %vm793_vm11 = vcmp.eq.s32.totalorder %v1463_v34, %v792_v47 }
  0xa4   :  { %v248_v14 = vpop.f32.mrf.mxu0 }
  0xa5   :  { %v549_v17 = vpop.f32.mrf.mxu1 }
  0xa6   :  { %v550_v43 = vadd.f32 %v549_v17, %v248_v14 }
  0xac   :  { %v562_v23 = vpop.f32.mrf.mxu2  ;;  %v250_v24 = vpop.f32.mrf.mxu0 }
  0xad   :  { %v551_v27 = vpop.f32.mrf.mxu1  ;;  %v575_v35 = vpop.f32.mrf.mxu3  ;;  %v563_v48 = vadd.f32 %v562_v23, %v550_v43 }
  0xaf   :  { %v576_v50 = vadd.f32 %v575_v35, %v563_v48 }
  0xb4   :  { %v564_v37 = vpop.f32.mrf.mxu2 }
  0xb5   :  { %v577_v45 = vpop.f32.mrf.mxu3 }
  0xc4   :  { %v588_v51 = vpop.f32.mrf.mxu0 }
  0xc5   :  { %v601_v52 = vpop.f32.mrf.mxu1  ;;  %v589_v53 = vadd.f32 %v588_v51, %v576_v50 }
  0xc7   :  { %v602_v54 = vadd.f32 %v601_v52, %v589_v53 }
  0xcc   :  { %v614_v56 = vpop.f32.mrf.mxu2  ;;  %v590_v58 = vpop.f32.mrf.mxu0 }
  0xcd   :  { %v615_v57 = vadd.f32 %v614_v56, %v602_v54  ;;  %v603_v59 = vpop.f32.mrf.mxu1 }
  0xcf   :  { %v622_v60 = vadd.f32 %v1235_v55, %v615_v57  ;;  %v1314_v55 = vmov 0.0  }
  0xd0   :  { %v794_v56 = vsel %vm793_vm11, 1.0, %v1314_v55  ;;  %vm874_vm11 = vcmp.eq.s32.totalorder %v1463_v34, 1 }
  0xd1   :  { %1237 = vtanh.f32 %v622_v60 }
  0xd4   :  { %v616_v61 = vpop.f32.mrf.mxu2 }
  0xd7   :  { %v1238_v62 = vpop.eup %1237 }
  0xd8   :  { %v706_v63 = vsel %vm705_vm4, %v1238_v62, 0.0  ;;  %v624_v0 = vpack.c.bf16 %v1238_v62, %v1238_v62 }
  0xd9   :  { %v708_v1 = vsel %vm707_vm5, %v706_v63, 0.0 }
  0xda   :  { %709 = vadd.xlane.f32.xlu0 %v708_v1  ;;  %1163 = vmatmul.msk.bf16.vlgmr.msrb.gmra.mxu3 %vm673_vm6, %v624_v0 }
  0xea   :  { %1164 = vmatmul.msk.bf16.vlgmr.msra.gmra.mxu3 %vm673_vm6, %v624_v0 }
 0x14d   :  { %v710_v10 = vpop.xlane.xlu0 %709 }
 0x14e   :  { %v715_v11 = vmul.f32 %v712_v4, %v710_v10 }
 0x15d   :  { %v686_v5 = vpop.f32.mrf.mxu3 }
 0x15e   :  { %v714_v6 = vadd.f32 %v712_v4, %v686_v5 }
 0x160   :  { %v723_v7 = vsel %vm722_vm7, %v714_v6, -1e+30 }
 0x161   :  { %v725_v8 = vsel %vm724_vm8, %v723_v7, -inf }
 0x162   :  { %726 = vmax.xlane.f32.xlu1 %v725_v8 }
 0x165   :  { %v688_v9 = vpop.f32.mrf.mxu3 }
 0x16d   :  { %v699_v13 = vpop.f32.mrf.mxu3 }
 0x16e   :  { %v716_v14 = vadd.f32 %v715_v11, %v699_v13  ;;  %v717_v15 = vadd.f32 %v699_v13, %v686_v5 }
 0x170   :  { %v749_v16 = vsel %vm722_vm7, %v716_v14, -1e+30  ;;  %v721_v17 = vadd.f32 %v1236_v12, %v717_v15 }
 0x171   :  { %v750_v18 = vsel %vm724_vm8, %v749_v16, -inf }
 0x172   :  { %751 = vmax.xlane.f32.xlu0 %v750_v18  ;;  %v774_v20 = vsel %vm722_vm7, %v721_v17, -1e+30  ;;  %871 = vst [vmem:[#allocation5] sm:$0x3] %v721_v17 }
 0x173   :  { %v775_v21 = vsel %vm724_vm8, %v774_v20, -inf  ;;  %894 = dma.vmem_to_hbm [thread:$0]  %s890_s1, 32, %s892_s21, [#allocation6]  }
 0x174   :  { %776 = vmax.xlane.f32.xlu2 %v775_v21 }
 0x175   :  { %v701_v22 = vpop.f32.mrf.mxu3 }
 0x1d5   :  { %v727_v23 = vpop.xlane.xlu1 %726 }
 0x1d6   :  { %v728_v24 = vsub.f32 %v723_v7, %v727_v23 }
 0x1d8   :  { %v729_v25 = vmul.f32 1.442695, %v728_v24 }
 0x1da   :  { %1239 = vpow2.f32 %v729_v25 }
 0x1e0   :  { %v1240_v26 = vpop.eup %1239 }
 0x1e1   :  { %v731_v27 = vsel %vm724_vm8, %v1240_v26, 0.0 }
 0x1e2   :  { %732 = vadd.xlane.f32.xlu2 %v731_v27 }
 0x1e5   :  { %v752_v28 = vpop.xlane.xlu0 %751 }
 0x1e6   :  { %v753_v29 = vsub.f32 %v749_v16, %v752_v28 }
 0x1e7   :  { %v777_v30 = vpop.xlane.xlu2 %776 }
 0x1e8   :  { %v754_v31 = vmul.f32 1.442695, %v753_v29  ;;  %v778_v32 = vsub.f32 %v774_v20, %v777_v30 }
 0x1ea   :  { %1241 = vpow2.f32 %v754_v31  ;;  %v779_v33 = vmul.f32 1.442695, %v778_v32 }
 0x1ec   :  { %1243 = vpow2.f32 %v779_v33 }
 0x1f0   :  { %v1242_v35 = vpop.eup %1241 }
 0x1f1   :  { %v756_v36 = vsel %vm724_vm8, %v1242_v35, 0.0 }
 0x1f2   :  { %v1244_v37 = vpop.eup %1243  ;;  %757 = vadd.xlane.f32.xlu1 %v756_v36 }
 0x1f3   :  { %v781_v38 = vsel %vm724_vm8, %v1244_v37, 0.0 }
 0x1f4   :  { %782 = vadd.xlane.f32.xlu0 %v781_v38 }
 0x255   :  { %v733_v39 = vpop.xlane.xlu2 %732 }
 0x256   :  { %1245 = vrcp.f32 %v733_v39  ;;  %v745_v46 = vand.u32 2147483648, %v733_v39  ;;  %v743_v49 = vand.u32 2147483647, %v733_v39  ;;  %vm739_vm10 = vweird.f32 %v733_v39 }
 0x258   :  { %v746_v51 = vor.u32 1.1754944e-38, %v745_v46  ;;  %vm744_vm13 = vcmp.eq.f32.partialorder %v743_v49, 8.507059e+37 }
 0x25c   :  { %v1246_v41 = vpop.eup %1245 }
 0x25d   :  { %v735_v43 = vmul.f32 %v1246_v41, %v733_v39  ;;  %vm740_vm9 = vweird.f32 %v1246_v41 }
 0x25e   :  { %vm741_vm12 = vmor %vm739_vm10, %vm740_vm9 }
 0x25f   :  { %v736_v45 = vsub.f32 1.0, %v735_v43 }
 0x261   :  { %v737_v48 = vmul.f32 %v1246_v41, %v736_v45 }
 0x263   :  { %v738_v50 = vadd.f32 %v1246_v41, %v737_v48 }
 0x265   :  { %v758_v52 = vpop.xlane.xlu1 %757  ;;  %v742_v53 = vsel %vm741_vm12, %v1246_v41, %v738_v50  ;;  %vm872_vm12 = vcmp.eq.s32.totalorder %v1463_v34, 0 }
 0x266   :  { %1247 = vrcp.f32 %v758_v52  ;;  %v747_v54 = vsel %vm744_vm13, %v746_v51, %v742_v53  ;;  %v770_v1 = vand.u32 2147483648, %v758_v52  ;;  %v768_v4 = vand.u32 2147483647, %v758_v52 }
 0x267   :  { %v783_v57 = vpop.xlane.xlu0 %782  ;;  %v748_v58 = vmul.f32 %v1240_v26, %v747_v54  ;;  %vm764_vm15 = vweird.f32 %v758_v52  ;;  %vm877_vm13 = vcmp.eq.s32.totalorder %v1463_v34, 2 }
 0x268   :  { %1249 = vlog2.f32 %v783_v57  ;;  %v771_v7 = vor.u32 1.1754944e-38, %v770_v1  ;;  %vm769_vm1 = vcmp.eq.f32.partialorder %v768_v4, 8.507059e+37 }
 0x269   :  { %v795_v19 = vmul.f32 %v794_v56, %v748_v58 }
 0x26b   :  { %v796_v59 = vsel %vm724_vm8, %v795_v19, 0.0 }
 0x26c   :  { %v1248_v60 = vpop.eup %1247  ;;  %797 = vadd.xlane.f32.xlu2 %v796_v59 }
 0x26d   :  { %v760_v61 = vmul.f32 %v1248_v60, %v758_v52  ;;  %vm765_vm14 = vweird.f32 %v1248_v60 }
 0x26e   :  { %v1250_v62 = vpop.eup %1249  ;;  %vm766_vm0 = vmor %vm764_vm15, %vm765_vm14  ;;  %vm880_vm14 = vcmp.eq.s32.totalorder %v1463_v34, 3 }
 0x26f   :  { %v761_v63 = vsub.f32 1.0, %v760_v61  ;;  %v785_v0 = vmul.f32 0.6931472, %v1250_v62 }
 0x271   :  { %v762_v2 = vmul.f32 %v1248_v60, %v761_v63  ;;  %v786_v3 = vsub.f32 %v778_v32, %v785_v0 }
 0x273   :  { %v817_v5 = vmul.f32 %v794_v56, %v786_v3  ;;  %v763_v6 = vadd.f32 %v1248_v60, %v762_v2 }
 0x275   :  { %v818_v8 = vsel %vm724_vm8, %v817_v5, 0.0  ;;  %v767_v9 = vsel %vm766_vm0, %v1248_v60, %v763_v6 }
 0x276   :  { %819 = vadd.xlane.f32.xlu0 %v818_v8  ;;  %v772_v10 = vsel %vm769_vm1, %v771_v7, %v767_v9 }
 0x277   :  { %v773_v11 = vmul.f32 %v1242_v35, %v772_v10 }
 0x279   :  { %v806_v12 = vmul.f32 %v794_v56, %v773_v11 }
 0x27b   :  { %v807_v13 = vsel %vm724_vm8, %v806_v12, 0.0 }
 0x27c   :  { %808 = vadd.xlane.f32.xlu1 %v807_v13 }
 0x2df   :  { %v798_v17 = vpop.xlane.xlu2 %797 }
 0x2e0   :  { %v799_v20 = vsel %vm724_vm8, %v798_v17, 0.0 }
 0x2e1   :  { %v800_v23 = vrot.slane %v799_v20, 4 }
 0x2e3   :  { %v801_v26 = vadd.f32 %v800_v23, %v799_v20 }
 0x2e5   :  { %v802_v27 = vrot.slane %v801_v26, 2 }
 0x2e7   :  { %v803_v29 = vadd.f32 %v802_v27, %v801_v26 }
 0x2e9   :  { %v820_v32 = vpop.xlane.xlu0 %819  ;;  %v804_v35 = vrot.slane %v803_v29, 1 }
 0x2ea   :  { %v821_v38 = vsel %vm724_vm8, %v820_v32, 0.0 }
 0x2eb   :  { %v805_v41 = vadd.f32 %v804_v35, %v803_v29  ;;  %v822_v43 = vrot.slane %v821_v38, 4 }
 0x2ed   :  { %v823_v46 = vadd.f32 %v822_v43, %v821_v38 }
 0x2ef   :  { %v809_v14 = vpop.xlane.xlu1 %808  ;;  %v824_v48 = vrot.slane %v823_v46, 2 }
 0x2f0   :  { %v810_v15 = vsel %vm724_vm8, %v809_v14, 0.0 }
 0x2f1   :  { %v811_v16 = vrot.slane %v810_v15, 4  ;;  %v825_v52 = vadd.f32 %v824_v48, %v823_v46 }
 0x2f3   :  { %v812_v18 = vadd.f32 %v811_v16, %v810_v15  ;;  %v826_v57 = vrot.slane %v825_v52, 1 }
 0x2f5   :  { %v813_v21 = vrot.slane %v812_v18, 2  ;;  %v827_v62 = vadd.f32 %v826_v57, %v825_v52 }
 0x2f7   :  { %v814_v22 = vadd.f32 %v813_v21, %v812_v18  ;;  %v828_v2 = vsub.f32 0.0, %v827_v62 }
 0x2f9   :  { %v815_v24 = vrot.slane %v814_v22, 1  ;;  %v829_v4 = vmul.f32 0.5, %v828_v2 }
 0x2fb   :  { %v816_v25 = vadd.f32 %v815_v24, %v814_v22  ;;  %v873_v8 = vsel %vm872_vm12, %v829_v4, 0.0 }
 0x2fd   :  { %1251 = vrcp.f32 %v816_v25  ;;  %v841_v33 = vand.u32 2147483648, %v816_v25  ;;  %v839_v37 = vand.u32 2147483647, %v816_v25  ;;  %vm835_vm3 = vweird.f32 %v816_v25 }
 0x2ff   :  { %v842_v40 = vor.u32 1.1754944e-38, %v841_v33  ;;  %vm840_vm5 = vcmp.eq.f32.partialorder %v839_v37, 8.507059e+37 }
 0x303   :  { %v1252_v28 = vpop.eup %1251 }
 0x304   :  { %v831_v30 = vmul.f32 %v1252_v28, %v816_v25  ;;  %vm836_vm2 = vweird.f32 %v1252_v28 }
 0x305   :  { %vm837_vm4 = vmor %vm835_vm3, %vm836_vm2 }
 0x306   :  { %v832_v31 = vsub.f32 1.0, %v831_v30 }
 0x308   :  { %v833_v36 = vmul.f32 %v1252_v28, %v832_v31 }
 0x30a   :  { %v834_v39 = vadd.f32 %v1252_v28, %v833_v36 }
 0x30c   :  { %v838_v42 = vsel %vm837_vm4, %v1252_v28, %v834_v39 }
 0x30d   :  { %v843_v44 = vsel %vm840_vm5, %v842_v40, %v838_v42 }
 0x30e   :  { %v844_v45 = vmul.f32 %v843_v44, %v805_v41 }
 0x310   :  { %1253 = vrcp.f32 %v844_v45  ;;  %v861_v47 = vmax.f32 %v844_v45, 0.0  ;;  %v856_v54 = vand.u32 2147483648, %v844_v45  ;;  %v854_v56 = vand.u32 2147483647, %v844_v45 }
 0x311   :  { %vm850_vm7 = vweird.f32 %v844_v45  ;;  %vm860_vm10 = vcmp.gt.f32.partialorder %v844_v45, 1.0  ;;  %v881_v13 = vsel %vm880_vm14, %v844_v45, 0.0 }
 0x312   :  { %v862_v51 = vmul.f32 0.5, %v861_v47  ;;  %v857_v19 = vor.u32 1.1754944e-38, %v856_v54  ;;  %vm855_vm9 = vcmp.eq.f32.partialorder %v854_v56, 8.507059e+37 }
 0x314   :  { %1255 = vtanh.f32 %v862_v51 }
 0x316   :  { %v1254_v49 = vpop.eup %1253 }
 0x317   :  { %v846_v50 = vmul.f32 %v1254_v49, %v844_v45  ;;  %vm851_vm6 = vweird.f32 %v1254_v49 }
 0x318   :  { %vm852_vm8 = vmor %vm850_vm7, %vm851_vm6 }
 0x319   :  { %v847_v53 = vsub.f32 1.0, %v846_v50 }
 0x31a   :  { %v1256_v61 = vpop.eup %1255 }
 0x31b   :  { %v848_v55 = vmul.f32 %v1254_v49, %v847_v53  ;;  %v864_v1 = vsub.f32 1.0, %v1256_v61 }
 0x31d   :  { %v849_v58 = vadd.f32 %v1254_v49, %v848_v55  ;;  %v865_v3 = vsel %vm860_vm10, %v864_v1, 1.0 }
 0x31e   :  { %v875_v6 = vsel %vm874_vm11, %v865_v3, 0.0 }
 0x31f   :  { %v853_v59 = vsel %vm852_vm8, %v1254_v49, %v849_v58  ;;  %v876_v10 = vadd.f32 %v875_v6, %v873_v8 }
 0x320   :  { %v858_v60 = vsel %vm855_vm9, %v857_v19, %v853_v59 }
 0x321   :  { %v866_v63 = vmax.f32 %v858_v60, 0.0 }
 0x323   :  { %v867_v0 = vmul.f32 0.5, %v866_v63 }
 0x325   :  { %1257 = vtanh.f32 %v867_v0 }
 0x32b   :  { %v1258_v5 = vpop.eup %1257 }
 0x32c   :  { %v869_v7 = vsub.f32 1.0, %v1258_v5 }
 0x32e   :  { %v870_v9 = vsel %vm860_vm10, 1.0, %v869_v7 }
 0x32f   :  { %v878_v11 = vsel %vm877_vm13, %v870_v9, 0.0 }
 0x330   :  { %v879_v12 = vadd.f32 %v878_v11, %v876_v10 }
 0x332   :  { %v882_v14 = vadd.f32 %v881_v13, %v879_v12 }
 0x334   :  { %883 = vst [vmem:[%s1654_s8] sm:$0x1] %v882_v14 }
 0x335   :  { %1309 = dma.done.wait [#allocation6], 32  }
 0x336   :  { %1310 = vsyncadd [#allocation6], 4294967264 }
 0x337   :  { %903 = vsyncpa [#allocation6], 1 }

</bundles_post_ra>
